<compile_context>
chip_gen: v7x
topology: tpu7x:2x2x1
jax: 0.10.0
libtpu: 0.0.40
codegen_flags: <defaults>
</compile_context>

<pallas_src>
import jax
import jax.numpy as jnp
from jax.experimental import pallas as pl
from jax.experimental.pallas import tpu as pltpu

_NEG_INF = -1e30


def _round_up(x: int, m: int) -> int:
    return ((x + m - 1) // m) * m


def _derive_class_dim(num_classes: int) -> int:
    return _round_up(num_classes, 128)          # lane-dense MXU N dim


def _derive_d_tile(D: int, Kp: int):
    """Split-K tile TD and padded feature dim D_pad (VMEM-budget aware)."""
    td_cap = 2048
    # Keep the double-buffered bf16 W tile under ~12 MiB so the whole working
    # set (x dbuf + W dbuf + f32 acc) fits v5e's 16 MiB scoped default and
    # leaves plenty of headroom on v7x's 64 MiB physical VMEM.
    while td_cap > 128 and td_cap * Kp * 2 * 2 > 12 * 1024 * 1024:
        td_cap //= 2
    TD = min(td_cap, _round_up(D, 128))
    D_pad = _round_up(D, TD)
    return TD, D_pad


def prepare_linear_params(weight, bias):
    """Cast/pad classifier params ONCE (persist across training steps).

    Avoids paying a per-call f32->bf16 cast + pad pass over W, which would
    cost more HBM traffic than the kernel's own single-pass weight read.
    """
    D, K = weight.shape
    Kp = _derive_class_dim(K)
    _, D_pad = _derive_d_tile(D, Kp)
    w_p = jnp.pad(weight.astype(jnp.bfloat16), ((0, D_pad - D), (0, Kp - K)))
    # Padded classes get -1e30 via the bias (padded W columns are exactly 0),
    # so they vanish from the logsumexp with no in-kernel class mask.
    b_p = jnp.pad(bias.astype(jnp.float32), (0, Kp - K),
                  constant_values=_NEG_INF).reshape(1, Kp)
    return w_p, b_p


def _ce_kernel(x_ref, w_ref, b_ref, tgt_ref, out_ref, acc_ref):
    """Fused linear + cross-entropy kernel (one B-tile, split-K over D).

    x_ref:   [TB, TD]  bf16 activations tile
    w_ref:   [TD, Kp]  bf16 weight tile
    b_ref:   [1,  Kp]  f32 bias (padded classes hold -1e30)
    tgt_ref: [TB, 1]   int32 targets
    out_ref: [TB, 1]   f32 per-example loss
    acc_ref: [TB, Kp]  f32 logits accumulator (scratch)
    """
    # Read grid position ONCE at the top level; never inside pl.when bodies.
    d = pl.program_id(1)
    num_d = pl.num_programs(1)

    @pl.when(d == 0)
    def _():
        acc_ref[...] = jnp.zeros_like(acc_ref)

    acc_ref[...] += jnp.dot(x_ref[...], w_ref[...],
                            preferred_element_type=jnp.float32)

    @pl.when(d == num_d - 1)
    def _():
        logits = acc_ref[...] + b_ref[...]                  # [TB, Kp] f32
        m = jnp.max(logits, axis=-1, keepdims=True)         # [TB, 1]
        lse = jnp.log(jnp.sum(jnp.exp(logits - m), axis=-1,
                              keepdims=True)) + m           # [TB, 1]

        # Target-logit gather via iota compare (no one-hot HBM stream).
        col = jax.lax.broadcasted_iota(jnp.int32, logits.shape, 1)
        tgt_logit = jnp.sum(jnp.where(col == tgt_ref[...], logits, 0.0),
                            axis=-1, keepdims=True)         # [TB, 1]

        out_ref[...] = lse - tgt_logit


def combined_model_loss(x_nchw, target, w_p, b_p):
    """JAX wrapper: flatten NCHW input, pad/tile, call the Pallas kernel."""
    B = x_nchw.shape[0]
    D = 1
    for s in x_nchw.shape[1:]:
        D *= int(s)
    D_pad_w, Kp = w_p.shape
    TD, D_pad = _derive_d_tile(D, Kp)
    assert D_pad == D_pad_w, (D_pad, D_pad_w)

    # Batch tile: 256 fills the 256-wide v6e/v7x MXU and cuts the dominant
    # W re-stream 2x vs TB=128; small batches round to a multiple of 16
    # (bf16 sublane packing).  NOTE: tiny demo batches give a single B tile,
    # so v7x megacore sharding only kicks in for real batch sizes.
    TB = min(256, _round_up(B, 16))
    B_pad = _round_up(B, TB)

    x_flat = x_nchw.reshape(B, D).astype(jnp.bfloat16)
    if B_pad != B or D_pad != D:
        x_flat = jnp.pad(x_flat, ((0, B_pad - B), (0, D_pad - D)))
    t = target.astype(jnp.int32)
    if B_pad != B:
        t = jnp.pad(t, (0, B_pad - B))
    t = t.reshape(B_pad, 1)

    n_b = B_pad // TB
    n_d = D_pad // TD
    grid = (n_b, n_d)

    cost = pl.CostEstimate(
        flops=2 * B_pad * D_pad * Kp,
        transcendentals=B_pad * Kp,
        bytes_accessed=(x_flat.size * 2            # bf16 activations
                        + n_b * w_p.size * 2       # W streamed once per B tile
                        + b_p.size * 4 + t.size * 4 + B_pad * 4),
    )

    per_example = pl.pallas_call(
        _ce_kernel,
        out_shape=jax.ShapeDtypeStruct((B_pad, 1), jnp.float32),
        grid=grid,
        in_specs=[
            pl.BlockSpec((TB, TD), lambda i, d: (i, d)),   # x
            pl.BlockSpec((TD, Kp), lambda i, d: (d, 0)),   # W (heavy stream)
            pl.BlockSpec((1, Kp), lambda i, d: (0, 0)),    # bias
            pl.BlockSpec((TB, 1), lambda i, d: (i, 0)),    # targets
        ],
        out_specs=pl.BlockSpec((TB, 1), lambda i, d: (i, 0)),
        scratch_shapes=[pltpu.VMEM((TB, Kp), jnp.float32)],
        compiler_params=pltpu.CompilerParams(
            dimension_semantics=("parallel", "arbitrary"),
            # Explicit limit: v5e's scoped-VMEM default is only 16 MiB.
            vmem_limit_bytes=32 * 1024 * 1024),
        cost_estimate=cost,
    )(x_flat, w_p, b_p, t)

    # Mean over the GLOBAL batch; padded rows are simply sliced away here, so
    # the kernel epilogue needs no row-validity mask.
    return jnp.sum(per_example[:B, 0]) / B


def _reference_loss(x_nchw, target, weight, bias):
    """Pure-JAX reference (bf16 operands, f32 accumulation) for checking."""
    B = x_nchw.shape[0]
    x_flat = x_nchw.reshape(B, -1).astype(jnp.bfloat16).astype(jnp.float32)
    w = weight.astype(jnp.bfloat16).astype(jnp.float32)
    logits = x_flat @ w + bias[None, :].astype(jnp.float32)
    logp = jax.nn.log_softmax(logits, axis=-1)
    nll = -jnp.take_along_axis(logp, target[:, None], axis=-1)[:, 0]
    return jnp.mean(nll)


if __name__ == "__main__":
    # Small shapes consistent with the forward pass:
    #   x: [B, C, H, W] image batch, target: [B] int class labels
    B, C, H, W = 2, 4, 16, 16
    K = 32                       # num_classes
    D = C * H * W                # flattened feature dim = 1024

    key = jax.random.PRNGKey(0)
    kx, kt, kw, kb = jax.random.split(key, 4)

    x = jax.random.normal(kx, (B, C, H, W), dtype=jnp.float32)
    target = jax.random.randint(kt, (B,), 0, K, dtype=jnp.int32)

    # Deterministic parameter init for the linear classifier base.
    weight = (jax.random.normal(kw, (D, K), dtype=jnp.float32)
              * (1.0 / jnp.sqrt(D)))
    bias = jax.random.normal(kb, (K,), dtype=jnp.float32) * 0.01

    # One-time parameter prep (bf16 cast + padding), reused across calls.
    w_p, b_p = prepare_linear_params(weight, bias)

    loss = jax.block_until_ready(
        jax.jit(combined_model_loss)(x, target, w_p, b_p))
    ref = jax.block_until_ready(_reference_loss(x, target, weight, bias))

    assert jnp.allclose(loss, ref, rtol=2e-3, atol=2e-3), (loss, ref)
    print("KERNEL_OK")
</pallas_src>

<mosaic_0001>
module attributes {stable_mosaic.version = 11 : i64} {
  func.func @_ce_kernel(%arg0: i32, %arg1: i32, %arg2: memref<16x1024xbf16, #tpu.memory_space<vmem>>, %arg3: memref<1024x128xbf16, #tpu.memory_space<vmem>>, %arg4: memref<1x128xf32, #tpu.memory_space<vmem>>, %arg5: memref<16x1xi32, #tpu.memory_space<vmem>>, %arg6: memref<16x1xf32, #tpu.memory_space<vmem>>, %arg7: memref<16x128xf32, #tpu.memory_space<vmem>>) attributes {dimension_semantics = [#tpu.dimension_semantics<parallel>, #tpu.dimension_semantics<arbitrary>], iteration_bounds = array<i64: 1, 1>, scalar_prefetch = 0 : i64, scratch_operands = 1 : i64, tpu.core_type = #tpu.core_type<tc>, window_params = [{transform_indices = @transform_0, window_bounds = array<i64: 16, 1024>}, {transform_indices = @transform_1, window_bounds = array<i64: 1024, 128>}, {pipeline_mode = #tpu.pipeline_mode<synchronous>, transform_indices = @transform_2, window_bounds = array<i64: 1, 128>}, {transform_indices = @transform_3, window_bounds = array<i64: 16, 1>}, {transform_indices = @transform_4, window_bounds = array<i64: 16, 1>}]} {
    %c0_i32 = arith.constant 0 : i32
    %0 = arith.cmpi eq, %arg1, %c0_i32 : i32
    %1 = arith.extui %0 : i1 to i32
    %c0_i32_0 = arith.constant 0 : i32
    %2 = arith.cmpi ne, %1, %c0_i32_0 : i32
    scf.if %2 {
      %cst_10 = arith.constant 0.000000e+00 : f32
      %12 = vector.broadcast %cst_10 : f32 to vector<16x128xf32>
      %c0_11 = arith.constant 0 : index
      %c0_12 = arith.constant 0 : index
      %13 = vector.load %arg7[%c0_11, %c0_12] : memref<16x128xf32, #tpu.memory_space<vmem>>, vector<16x128xf32>
      tpu.vector_store %arg7[%c0_11, %c0_12], %12 {strides = array<i32>} : memref<16x128xf32, #tpu.memory_space<vmem>>, vector<16x128xf32>,
    } else {
    }
    %c0 = arith.constant 0 : index
    %c0_1 = arith.constant 0 : index
    %3 = vector.load %arg7[%c0, %c0_1] : memref<16x128xf32, #tpu.memory_space<vmem>>, vector<16x128xf32>
    %c0_2 = arith.constant 0 : index
    %c0_3 = arith.constant 0 : index
    %4 = vector.load %arg2[%c0_2, %c0_3] : memref<16x1024xbf16, #tpu.memory_space<vmem>>, vector<16x1024xbf16>
    %c0_4 = arith.constant 0 : index
    %c0_5 = arith.constant 0 : index
    %5 = vector.load %arg3[%c0_4, %c0_5] : memref<1024x128xbf16, #tpu.memory_space<vmem>>, vector<1024x128xbf16>
    %cst = arith.constant dense<0.000000e+00> : vector<16x128xf32>
    %6 = tpu.matmul %4, %5, %cst {dimension_numbers = #tpu.dot_dimension_numbers<[1], [0], [0], [1], [0, 0, 1, 1], [], []>} : vector<16x1024xbf16>, vector<1024x128xbf16>, vector<16x128xf32> -> vector<16x128xf32>
    %7 = arith.addf %3, %6 : vector<16x128xf32>
    %c0_6 = arith.constant 0 : index
    %c0_7 = arith.constant 0 : index
    %8 = vector.load %arg7[%c0_6, %c0_7] : memref<16x128xf32, #tpu.memory_space<vmem>>, vector<16x128xf32>
    tpu.vector_store %arg7[%c0_6, %c0_7], %7 {strides = array<i32>} : memref<16x128xf32, #tpu.memory_space<vmem>>, vector<16x128xf32>,
    %c0_i32_8 = arith.constant 0 : i32
    %9 = arith.cmpi eq, %arg1, %c0_i32_8 : i32
    %10 = arith.extui %9 : i1 to i32
    %c0_i32_9 = arith.constant 0 : i32
    %11 = arith.cmpi ne, %10, %c0_i32_9 : i32
    scf.if %11 {
      %c0_10 = arith.constant 0 : index
      %c0_11 = arith.constant 0 : index
      %12 = vector.load %arg7[%c0_10, %c0_11] : memref<16x128xf32, #tpu.memory_space<vmem>>, vector<16x128xf32>
      %c0_12 = arith.constant 0 : index
      %c0_13 = arith.constant 0 : index
      %13 = vector.load %arg4[%c0_12, %c0_13] : memref<1x128xf32, #tpu.memory_space<vmem>>, vector<1x128xf32>
      %14 = vector.broadcast %13 : vector<1x128xf32> to vector<16x128xf32>
      %15 = arith.addf %12, %14 : vector<16x128xf32>
      %cst_14 = arith.constant dense<0xFF800000> : vector<16xf32>
      %16 = vector.multi_reduction <maximumf>, %15, %cst_14 [1] : vector<16x128xf32> to vector<16xf32>
      %17 = vector.shape_cast %16 : vector<16xf32> to vector<16x1xf32>
      %18 = vector.broadcast %17 : vector<16x1xf32> to vector<16x128xf32>
      %19 = arith.subf %15, %18 : vector<16x128xf32>
      %20 = math.exp %19 : vector<16x128xf32>
      %cst_15 = arith.constant dense<0.000000e+00> : vector<16xf32>
      %21 = vector.multi_reduction <add>, %20, %cst_15 [1] : vector<16x128xf32> to vector<16xf32>
      %22 = vector.shape_cast %21 : vector<16xf32> to vector<16x1xf32>
      %23 = math.log %22 : vector<16x1xf32>
      %24 = arith.addf %23, %17 : vector<16x1xf32>
      %25 = tpu.iota {dimensions = array<i32: 1>} : vector<16x128xi32>
      %c0_16 = arith.constant 0 : index
      %c0_17 = arith.constant 0 : index
      %26 = vector.load %arg5[%c0_16, %c0_17] : memref<16x1xi32, #tpu.memory_space<vmem>>, vector<16x1xi32>
      %27 = vector.broadcast %26 : vector<16x1xi32> to vector<16x128xi32>
      %28 = arith.cmpi eq, %25, %27 : vector<16x128xi32>
      %cst_18 = arith.constant 0.000000e+00 : f32
      %29 = vector.broadcast %cst_18 : f32 to vector<16x128xf32>
      %30 = arith.select %28, %15, %29 : vector<16x128xi1>, vector<16x128xf32>
      %cst_19 = arith.constant dense<0.000000e+00> : vector<16xf32>
      %31 = vector.multi_reduction <add>, %30, %cst_19 [1] : vector<16x128xf32> to vector<16xf32>
      %32 = vector.shape_cast %31 : vector<16xf32> to vector<16x1xf32>
      %33 = arith.subf %24, %32 : vector<16x1xf32>
      %c0_20 = arith.constant 0 : index
      %c0_21 = arith.constant 0 : index
      %34 = vector.load %arg6[%c0_20, %c0_21] : memref<16x1xf32, #tpu.memory_space<vmem>>, vector<16x1xf32>
      tpu.vector_store %arg6[%c0_20, %c0_21], %33 {strides = array<i32>} : memref<16x1xf32, #tpu.memory_space<vmem>>, vector<16x1xf32>,
    } else {
    }
    return
  }
  func.func @transform_0(%arg0: i32, %arg1: i32) -> (i32, i32) {
    %c0_i32 = arith.constant 0 : i32
    return %arg0, %arg1 : i32, i32
  }
  func.func @transform_1(%arg0: i32, %arg1: i32) -> (i32, i32) {
    %c0_i32 = arith.constant 0 : i32
    %c0_i32_0 = arith.constant 0 : i32
    return %arg1, %c0_i32 : i32, i32
  }
  func.func @transform_2(%arg0: i32, %arg1: i32) -> (i32, i32) {
    %c0_i32 = arith.constant 0 : i32
    %c0_i32_0 = arith.constant 0 : i32
    %c0_i32_1 = arith.constant 0 : i32
    return %c0_i32, %c0_i32_0 : i32, i32
  }
  func.func @transform_3(%arg0: i32, %arg1: i32) -> (i32, i32) {
    %c0_i32 = arith.constant 0 : i32
    %c0_i32_0 = arith.constant 0 : i32
    return %arg0, %c0_i32 : i32, i32
  }
  func.func @transform_4(%arg0: i32, %arg1: i32) -> (i32, i32) {
    %c0_i32 = arith.constant 0 : i32
    %c0_i32_0 = arith.constant 0 : i32
    return %arg0, %c0_i32 : i32, i32
  }
}

</mosaic_0001>

<bundles_post_ra>
// kernel: combined_model_loss.1
= control target key start
LH: loop header
LB: loop body
LE: loop exit
PB: predicated region body
PF: predicated region fallthrough
CT: control target
= control target key end

     0   :  { %9 = vsyncpa [#allocation4], 0  ;;  %s1093_s15 = smov [#allocation3]   ;;  %s1173_s0 = inlined_call_operand.vmem [shape: bf16[16,1024], index: 0, kind: input, shape index: {}]   ;;  %s1174_s1 = inlined_call_operand.hbm [shape: bf16[1024,128], index: 1, kind: input, shape index: {}]   ;;  %s1175_s2 = inlined_call_operand.vmem [shape: f32[1,128], index: 2, kind: input, shape index: {}]   ;;  %s1176_s3 = inlined_call_operand.vmem [shape: s32[16,1], index: 3, kind: input, shape index: {}]   ;;  %s1177_s4 = inlined_call_operand.vmem [shape: f32[16,1], index: 4, kind: output, shape index: {}]  }
   0x1   :  { %s17_s16 = sshll.u32 %s1093_s15, 4  ;;  %s1069_s19 = scalar_lea.hbm %s1174_s1, 8192  ;;  %s18_s16 = int_to_ptr.vmem [resolvable:$true] %s17_s16 }
   0x2   :  { %p1070_p0 = scmp.ne.s32.totalorder %s1174_s1, %s1069_s19  ;;  %p1073_p1 = scmp.lt.u32.totalorder %s1069_s19, %s1174_s1 }
   0x4   :  { %p1075_p2 = pnand %p1073_p1, %p1070_p0 }
   0x6   :  { %1078 = shalt.err (!%p1075_p2)
}
   0x7   :  { %s1079_s24 = scalar_lea.vmem %s18_s16, 8192  ;;  %p1084_p4 = scmp.lt.s32.totalorder %s18_s16, %s18_s16 }
   0x8   :  { %p1080_p3 = scmp.ne.s32.totalorder %s18_s16, %s1079_s24  ;;  %p1085_p5 = scmp.lt.s32.totalorder %s1079_s24, %s1079_s24 }
   0xa   :  { %p1086_p6 = por %p1085_p5, %p1084_p4 }
   0xc   :  { %p1087_p7 = pnand %p1086_p6, %p1080_p3 }
   0xe   :  { %1090 = shalt.err (!%p1087_p7)
}
   0xf   :  { %s1094_s25 = smov 64   ;;  %s1095_s26 = smov 4  }
  0x10   :  { %23 = dma.hbm_to_vmem [thread:$0]  %s1174_s1, 8192, %s18_s16, [#allocation4], %s1094_s25, %s1094_s25, %s1095_s26  }
  0x11   :  { %1091 = dma.done.wait [#allocation4], 8192  }
  0x12   :  { %1092 = vsyncadd [#allocation4], 4294959104  ;;  %v1096_v0 = vmov 0   ;;  %v997_v1 = vld [vmem:[#allocation3 + $0x40] sm:$0xff]   ;;  %v1001_v5 = vld [vmem:[#allocation3 + $0x48] sm:$0xff]   ;;  %vm822_vm2 = vcmask 7168  }
  0x13   :  { %995 = vset.pattern.permute.xlu1 %v1096_v0  ;;  %996 = vset.pattern.permute.xlu0 %v1096_v0  ;;  %v998_v2 = vld [vmem:[#allocation3 + $0xc0] sm:$0xff]   ;;  %v1002_v6 = vld [vmem:[#allocation3 + $0xc8] sm:$0xff]   ;;  %v1005_v9 = vld [vmem:[#allocation3 + $0x50] sm:$0xff]  }
  0x14   :  { %903 = vmatprep.subr.bf16.mxu0 %v997_v1  ;;  %v999_v3 = vld [vmem:[#allocation3] sm:$0xff]   ;;  %925 = vmatprep.subr.bf16.mxu1 %v998_v2  ;;  %v1003_v7 = vld [vmem:[#allocation3 + $0x8] sm:$0xff]   ;;  %v1006_v10 = vld [vmem:[#allocation3 + $0xd0] sm:$0xff]  }
  0x15   :  { %v1000_v4 = vld [vmem:[#allocation3 + $0x80] sm:$0xff]   ;;  %904 = vmatpush3.bf16.msra.mxu0 %v999_v3  ;;  %v1004_v8 = vld [vmem:[#allocation3 + $0x88] sm:$0xff]   ;;  %v1007_v11 = vld [vmem:[#allocation3 + $0x10] sm:$0xff]  }
  0x16   :  { %926 = vmatpush3.bf16.msra.mxu1 %v1000_v4  ;;  %905 = vmatprep.subr.bf16.mxu0 %v1001_v5  ;;  %v1008_v12 = vld [vmem:[#allocation3 + $0x90] sm:$0xff]   ;;  %v1009_v13 = vld [vmem:[#allocation3 + $0x58] sm:$0xff]   ;;  %v1013_v17 = vld [vmem:[#allocation3 + $0x60] sm:$0xff]  }
  0x17   :  { %927 = vmatprep.subr.bf16.mxu1 %v1002_v6  ;;  %v1010_v14 = vld [vmem:[#allocation3 + $0xd8] sm:$0xff]   ;;  %v1014_v18 = vld [vmem:[#allocation3 + $0xe0] sm:$0xff]   ;;  %v1017_v21 = vld [vmem:[#allocation3 + $0x68] sm:$0xff]  }
  0x18   :  { %v1011_v15 = vld [vmem:[#allocation3 + $0x18] sm:$0xff]   ;;  %v1015_v19 = vld [vmem:[#allocation3 + $0x20] sm:$0xff]   ;;  %v1018_v22 = vld [vmem:[#allocation3 + $0xe8] sm:$0xff]  }
  0x19   :  { %906 = vmatpush3.bf16.msra.mxu0 %v1003_v7  ;;  %v1012_v16 = vld [vmem:[#allocation3 + $0x98] sm:$0xff]   ;;  %v1016_v20 = vld [vmem:[#allocation3 + $0xa0] sm:$0xff]   ;;  %v1019_v23 = vld [vmem:[#allocation3 + $0x28] sm:$0xff]  }
  0x1a   :  { %928 = vmatpush3.bf16.msra.mxu1 %v1004_v8  ;;  %907 = vmatprep.subr.bf16.mxu0 %v1005_v9  ;;  %v1020_v24 = vld [vmem:[#allocation3 + $0xa8] sm:$0xff]   ;;  %v1021_v25 = vld [vmem:[#allocation3 + $0x70] sm:$0xff]   ;;  %v1025_v29 = vld [vmem:[#allocation3 + $0x78] sm:$0xff]  }
  0x1b   :  { %929 = vmatprep.subr.bf16.mxu1 %v1006_v10  ;;  %v1022_v26 = vld [vmem:[#allocation3 + $0xf0] sm:$0xff]   ;;  %v1026_v30 = vld [vmem:[#allocation3 + $0xf8] sm:$0xff]   ;;  %v40_v33 = vld [vmem:[%s1173_s0] sm:$0xff] }
  0x1c   :  { %v1023_v27 = vld [vmem:[#allocation3 + $0x30] sm:$0xff]   ;;  %v1027_v31 = vld [vmem:[#allocation3 + $0x38] sm:$0xff]   ;;  %v44_v34 = vld [vmem:[%s1173_s0 + $0x20] sm:$0xff] }
  0x1d   :  { %908 = vmatpush3.bf16.msra.mxu0 %v1007_v11  ;;  %v1024_v28 = vld [vmem:[#allocation3 + $0xb0] sm:$0xff]   ;;  %v1028_v32 = vld [vmem:[#allocation3 + $0xb8] sm:$0xff]   ;;  %v41_v35 = vld [vmem:[%s1173_s0 + $0x8] sm:$0xff]  ;;  %v830_v36 = vcombine.low %v40_v33, %v44_v34  ;;  %v831_v37 = vcombine.high %v40_v33, %v44_v34 }
  0x1e   :  { %930 = vmatpush3.bf16.msra.mxu1 %v1008_v12  ;;  %909 = vmatprep.subr.bf16.mxu0 %v1009_v13  ;;  %v45_v38 = vld [vmem:[%s1173_s0 + $0x28] sm:$0xff]  ;;  %v1029_v41 = vld [vmem:[#allocation3 + $0x140] sm:$0xff]   ;;  %v1037_v49 = vld [vmem:[#allocation3 + $0x150] sm:$0xff]  }
  0x1f   :  { %931 = vmatprep.subr.bf16.mxu1 %v1010_v14  ;;  %v832_v39 = vcombine.low %v41_v35, %v45_v38  ;;  %v833_v40 = vcombine.high %v41_v35, %v45_v38  ;;  %632 = vmatprep.mubr.bf16.mxu0 %v831_v37  ;;  %v1030_v42 = vld [vmem:[#allocation3 + $0x1c0] sm:$0xff]   ;;  %v1033_v45 = vld [vmem:[#allocation3 + $0x148] sm:$0xff]   ;;  %v1038_v50 = vld [vmem:[#allocation3 + $0x1d0] sm:$0xff]  }
  0x20   :  { %v1031_v43 = vld [vmem:[#allocation3 + $0x100] sm:$0xff]   ;;  %v1034_v46 = vld [vmem:[#allocation3 + $0x1c8] sm:$0xff]   ;;  %v1039_v51 = vld [vmem:[#allocation3 + $0x110] sm:$0xff]  }
  0x21   :  { %910 = vmatpush3.bf16.msra.mxu0 %v1011_v15  ;;  %673 = vmatprep.mubr.bf16.mxu1 %v833_v40  ;;  %v1032_v44 = vld [vmem:[#allocation3 + $0x180] sm:$0xff]   ;;  %v1035_v47 = vld [vmem:[#allocation3 + $0x108] sm:$0xff]   ;;  %v1040_v52 = vld [vmem:[#allocation3 + $0x190] sm:$0xff]  }
  0x22   :  { %932 = vmatpush3.bf16.msra.mxu1 %v1012_v16  ;;  %911 = vmatprep.subr.bf16.mxu0 %v1013_v17  ;;  %v1036_v48 = vld [vmem:[#allocation3 + $0x188] sm:$0xff]   ;;  %v1041_v53 = vld [vmem:[#allocation3 + $0x158] sm:$0xff]   ;;  %v1045_v57 = vld [vmem:[#allocation3 + $0x160] sm:$0xff]  }
  0x23   :  { %933 = vmatprep.subr.bf16.mxu1 %v1014_v18  ;;  %v1042_v54 = vld [vmem:[#allocation3 + $0x1d8] sm:$0xff]   ;;  %v1046_v58 = vld [vmem:[#allocation3 + $0x1e0] sm:$0xff]   ;;  %v1049_v61 = vld [vmem:[#allocation3 + $0x168] sm:$0xff]  }
  0x24   :  { %v1043_v55 = vld [vmem:[#allocation3 + $0x118] sm:$0xff]   ;;  %v1047_v59 = vld [vmem:[#allocation3 + $0x120] sm:$0xff]   ;;  %v1050_v62 = vld [vmem:[#allocation3 + $0x1e8] sm:$0xff]  }
  0x25   :  { %912 = vmatpush3.bf16.msra.mxu0 %v1015_v19  ;;  %v1044_v56 = vld [vmem:[#allocation3 + $0x198] sm:$0xff]   ;;  %v1048_v60 = vld [vmem:[#allocation3 + $0x1a0] sm:$0xff]   ;;  %v1051_v63 = vld [vmem:[#allocation3 + $0x128] sm:$0xff]  }
  0x26   :  { %934 = vmatpush3.bf16.msra.mxu1 %v1016_v20  ;;  %913 = vmatprep.subr.bf16.mxu0 %v1017_v21  ;;  %v1052_v0 = vld [vmem:[#allocation3 + $0x1a8] sm:$0xff]   ;;  %v1053_v1 = vld [vmem:[#allocation3 + $0x170] sm:$0xff]   ;;  %v1057_v5 = vld [vmem:[#allocation3 + $0x178] sm:$0xff]  }
  0x27   :  { %935 = vmatprep.subr.bf16.mxu1 %v1018_v22  ;;  %v1054_v2 = vld [vmem:[#allocation3 + $0x1f0] sm:$0xff]   ;;  %v1058_v6 = vld [vmem:[#allocation3 + $0x1f8] sm:$0xff]   ;;  %v804_v15 = vld [vmem:[%s1176_s3] sm:$0xff] }
  0x28   :  { %v1055_v3 = vld [vmem:[#allocation3 + $0x130] sm:$0xff]   ;;  %v1059_v7 = vld [vmem:[#allocation3 + $0x138] sm:$0xff]   ;;  %807 = vperm.xlu1 %995, %v804_v15   ;;  %v805_v18 = vld [vmem:[%s1176_s3 + $0x8] sm:$0xff] }
  0x29   :  { %914 = vmatpush3.bf16.msra.mxu0 %v1019_v23  ;;  %v1056_v4 = vld [vmem:[#allocation3 + $0x1b0] sm:$0xff]   ;;  %v1060_v8 = vld [vmem:[#allocation3 + $0x1b8] sm:$0xff]  }
  0x2a   :  { %936 = vmatpush3.bf16.msra.mxu1 %v1020_v24  ;;  %915 = vmatprep.subr.bf16.mxu0 %v1021_v25  ;;  %v42_v9 = vld [vmem:[%s1173_s0 + $0x10] sm:$0xff]  ;;  %v43_v13 = vld [vmem:[%s1173_s0 + $0x18] sm:$0xff] }
  0x2b   :  { %937 = vmatprep.subr.bf16.mxu1 %v1022_v26  ;;  %v46_v10 = vld [vmem:[%s1173_s0 + $0x30] sm:$0xff]  ;;  %v47_v14 = vld [vmem:[%s1173_s0 + $0x38] sm:$0xff] }
  0x2c   :  { %v834_v11 = vcombine.low %v42_v9, %v46_v10  ;;  %v835_v12 = vcombine.high %v42_v9, %v46_v10  ;;  %v836_v16 = vcombine.low %v43_v13, %v47_v14  ;;  %v837_v17 = vcombine.high %v43_v13, %v47_v14  ;;  %810 = vperm.xlu1 %995, %v805_v18  }
  0x2d   :  { %916 = vmatpush3.bf16.msra.mxu0 %v1023_v27 }
  0x2e   :  { %938 = vmatpush3.bf16.msra.mxu1 %v1024_v28  ;;  %917 = vmatprep.subr.bf16.mxu0 %v1025_v29 }
  0x2f   :  { %939 = vmatprep.subr.bf16.mxu1 %v1026_v30 }
  0x31   :  { %918 = vmatpush3.bf16.msra.mxu0 %v1027_v31 }
  0x32   :  { %940 = vmatpush3.bf16.msra.mxu1 %v1028_v32  ;;  %947 = vmatprep.subr.bf16.mxu0 %v1029_v41 }
  0x33   :  { %969 = vmatprep.subr.bf16.mxu1 %v1030_v42 }
  0x34   :  { %633 = vmatmul.mubr.bf16.vlgmr.msra.gmra.mrb[0].mxu0 %v830_v36 }
  0x35   :  { %674 = vmatmul.mubr.bf16.vlgmr.msra.gmra.mrb[0].mxu1 %v832_v39  ;;  %948 = vmatpush3.bf16.msra.mxu0 %v1031_v43 }
  0x36   :  { %970 = vmatpush3.bf16.msra.mxu1 %v1032_v44  ;;  %949 = vmatprep.subr.bf16.mxu0 %v1033_v45 }
  0x37   :  { %971 = vmatprep.subr.bf16.mxu1 %v1034_v46  ;;  %714 = vmatprep.mubr.bf16.mxu0 %v835_v12  ;;  %v902_v46 = vld [vmem:[%s1175_s2] ss:$0 sm:$0xff] }
  0x38   :  { %755 = vmatprep.mubr.bf16.mxu1 %v837_v17 }
  0x39   :  { %950 = vmatpush3.bf16.msra.mxu0 %v1035_v47 }
  0x3a   :  { %972 = vmatpush3.bf16.msra.mxu1 %v1036_v48  ;;  %951 = vmatprep.subr.bf16.mxu0 %v1037_v49 }
  0x3b   :  { %973 = vmatprep.subr.bf16.mxu1 %v1038_v50 }
  0x3d   :  { %952 = vmatpush3.bf16.msra.mxu0 %v1039_v51 }
  0x3e   :  { %974 = vmatpush3.bf16.msra.mxu1 %v1040_v52  ;;  %953 = vmatprep.subr.bf16.mxu0 %v1041_v53 }
  0x3f   :  { %975 = vmatprep.subr.bf16.mxu1 %v1042_v54 }
  0x41   :  { %954 = vmatpush3.bf16.msra.mxu0 %v1043_v55 }
  0x42   :  { %976 = vmatpush3.bf16.msra.mxu1 %v1044_v56  ;;  %955 = vmatprep.subr.bf16.mxu0 %v1045_v57 }
  0x43   :  { %977 = vmatprep.subr.bf16.mxu1 %v1046_v58  ;;  %v802_v58 = vlaneseq }
  0x45   :  { %956 = vmatpush3.bf16.msra.mxu0 %v1047_v59 }
  0x46   :  { %978 = vmatpush3.bf16.msra.mxu1 %v1048_v60  ;;  %957 = vmatprep.subr.bf16.mxu0 %v1049_v61  ;;  %v803_v60 = vand.u32 127, %v802_v58 }
  0x47   :  { %979 = vmatprep.subr.bf16.mxu1 %v1050_v62 }
  0x49   :  { %958 = vmatpush3.bf16.msra.mxu0 %v1051_v63 }
  0x4a   :  { %980 = vmatpush3.bf16.msra.mxu1 %v1052_v0  ;;  %959 = vmatprep.subr.bf16.mxu0 %v1053_v1 }
  0x4b   :  { %981 = vmatprep.subr.bf16.mxu1 %v1054_v2 }
  0x4d   :  { %960 = vmatpush3.bf16.msra.mxu0 %v1055_v3 }
  0x4e   :  { %982 = vmatpush3.bf16.msra.mxu1 %v1056_v4  ;;  %961 = vmatprep.subr.bf16.mxu0 %v1057_v5 }
  0x4f   :  { %983 = vmatprep.subr.bf16.mxu1 %v1058_v6 }
  0x51   :  { %962 = vmatpush3.bf16.msra.mxu0 %v1059_v7 }
  0x52   :  { %984 = vmatpush3.bf16.msra.mxu1 %v1060_v8 }
  0x54   :  { %715 = vmatmul.mubr.bf16.vlgmr.msra.gmra.mrb[4].mxu0 %v834_v11 }
  0x55   :  { %756 = vmatmul.mubr.bf16.vlgmr.msra.gmra.mrb[4].mxu1 %v836_v16 }
  0xa7   :  { %v808_v59 = vpop.permute.xlu1 %807 }
  0xa8   :  { %vm812_vm0 = vcmp.eq.s32.totalorder %v803_v60, %v808_v59 }
  0xab   :  { %v811_v62 = vpop.permute.xlu1 %810 }
  0xac   :  { %vm813_vm1 = vcmp.eq.s32.totalorder %v803_v60, %v811_v62 }
 0x107   :  { %v919_v19 = vpop.f32.mrb[0].mxu0 }
 0x108   :  { %v941_v20 = vpop.f32.mrb[0].mxu1  ;;  %v920_v21 = vpop.f32.mrb[1].mxu0 }
 0x109   :  { %v921_v22 = vadd.f32 %v920_v21, %v919_v19  ;;  %v942_v23 = vpop.f32.mrb[1].mxu1  ;;  %v922_v24 = vpop.f32.mrb[2].mxu0 }
 0x10a   :  { %v943_v25 = vadd.f32 %v942_v23, %v941_v20  ;;  %v944_v26 = vpop.f32.mrb[2].mxu1  ;;  %v923_v27 = vpop.f32.mrb[3].mxu0 }
 0x10b   :  { %v924_v28 = vadd.f32 %v923_v27, %v922_v24  ;;  %v945_v29 = vpop.f32.mrb[3].mxu1 }
 0x10c   :  { %v676_v30 = vadd.f32 %v943_v25, %v921_v22  ;;  %v946_v31 = vadd.f32 %v945_v29, %v944_v26 }
 0x10e   :  { %v679_v32 = vadd.f32 %v946_v31, %v924_v28 }
 0x127   :  { %v963_v33 = vpop.f32.mrb[4].mxu0 }
 0x128   :  { %v985_v34 = vpop.f32.mrb[4].mxu1  ;;  %v964_v35 = vpop.f32.mrb[5].mxu0 }
 0x129   :  { %v965_v36 = vadd.f32 %v964_v35, %v963_v33  ;;  %v986_v37 = vpop.f32.mrb[5].mxu1  ;;  %v966_v38 = vpop.f32.mrb[6].mxu0 }
 0x12a   :  { %v987_v39 = vadd.f32 %v986_v37, %v985_v34  ;;  %v988_v40 = vpop.f32.mrb[6].mxu1  ;;  %v967_v41 = vpop.f32.mrb[7].mxu0 }
 0x12b   :  { %v717_v42 = vadd.f32 %v965_v36, %v676_v30  ;;  %v968_v43 = vadd.f32 %v967_v41, %v966_v38  ;;  %v989_v44 = vpop.f32.mrb[7].mxu1 }
 0x12c   :  { %v990_v45 = vadd.f32 %v989_v44, %v988_v40 }
 0x12d   :  { %v758_v47 = vadd.f32 %v987_v39, %v717_v42  ;;  %v720_v48 = vadd.f32 %v968_v43, %v679_v32 }
 0x12f   :  { %v761_v49 = vadd.f32 %v990_v45, %v720_v48  ;;  %v780_v50 = vadd.f32 %v902_v46, %v758_v47 }
 0x131   :  { %782 = vmax.xlane.f32.xlu0 %v780_v50  ;;  %v781_v51 = vadd.f32 %v902_v46, %v761_v49  ;;  %v814_v0 = vsel %vm812_vm0, %v780_v50, 0.0 }
 0x133   :  { %v815_v1 = vsel %vm813_vm1, %v781_v51, 0.0 }
 0x135   :  { %784 = vmax.xlane.f32.xlu0 %v781_v51 }
 0x1be   :  { %v783_v52 = vpop.xlane.xlu0 %782 }
 0x1bf   :  { %v786_v53 = vsub.f32 %v780_v50, %v783_v52 }
 0x1c1   :  { %v788_v54 = vmul.f32 1.442695, %v786_v53 }
 0x1c2   :  { %v785_v55 = vpop.xlane.xlu0 %784 }
 0x1c3   :  { %1061 = vpow2.f32 %v788_v54  ;;  %v787_v56 = vsub.f32 %v781_v51, %v785_v55 }
 0x1c5   :  { %v790_v57 = vmul.f32 1.442695, %v787_v56 }
 0x1c7   :  { %1063 = vpow2.f32 %v790_v57 }
 0x1cd   :  { %v1062_v61 = vpop.eup %1061 }
 0x1ce   :  { %792 = vadd.xlane.f32.xlu0 %v1062_v61 }
 0x1d1   :  { %v1064_v63 = vpop.eup %1063 }
 0x1d2   :  { %794 = vadd.xlane.f32.xlu1 %v1064_v63  ;;  %816 = vadd.xlane.f32.xlu0 %v814_v0 }
 0x1d6   :  { %818 = vadd.xlane.f32.xlu0 %v815_v1 }
 0x25b   :  { %v793_v2 = vpop.xlane.xlu0 %792 }
 0x25c   :  { %1065 = vlog2.f32 %v793_v2 }
 0x25f   :  { %v795_v3 = vpop.xlane.xlu1 %794  ;;  %v817_v6 = vpop.xlane.xlu0 %816 }
 0x260   :  { %1067 = vlog2.f32 %v795_v3 }
 0x263   :  { %v819_v12 = vpop.xlane.xlu0 %818 }
 0x266   :  { %v1066_v4 = vpop.eup %1065 }
 0x267   :  { %v797_v5 = vmul.f32 0.6931472, %v1066_v4 }
 0x269   :  { %v800_v7 = vadd.f32 %v797_v5, %v783_v52 }
 0x26a   :  { %v1068_v8 = vpop.eup %1067 }
 0x26b   :  { %v799_v9 = vmul.f32 0.6931472, %v1068_v8  ;;  %v820_v10 = vsub.f32 %v800_v7, %v817_v6 }
 0x26d   :  { %823 = vst.msk [vmem:[%s1177_s4] sm:$0xff] %vm822_vm2, %v820_v10  ;;  %v801_v11 = vadd.f32 %v799_v9, %v785_v55 }
 0x26f   :  { %v821_v13 = vsub.f32 %v801_v11, %v819_v12 }
 0x271   :  { %824 = vst.msk [vmem:[%s1177_s4 + $0x8] sm:$0xff] %vm822_vm2, %v821_v13 }
 0x272   :  { %829 = vsyncpa [#allocation4], 1 }

</bundles_post_ra>
